<compile_context>
chip_gen: v5e
topology: v5e:2x2
jax: 0.10.0
libtpu: 0.0.40
codegen_flags: <defaults>
</compile_context>

<pallas_src>
import jax
import jax.numpy as jnp
from jax.experimental import pallas as pl
from jax.experimental.pallas import tpu as pltpu


def link_predictor_kernel(x_ref, w1_ref, aff_ref, w2_ref, b2_ref,
                          w3_ref, b3_ref, o_ref):
    # Feature-major operands: x is [IN_C, TN] bf16 with the batch on lanes.
    x = x_ref[...]

    b1 = aff_ref[:, 0:1]          # [H1, 1] f32
    scale = aff_ref[:, 1:2]       # BatchNorm1d eval-mode affine
    shift = aff_ref[:, 2:3]

    # lins[0]: Linear(in, h1) -> ReLU -> dropout (identity at inference)
    # TODO(synk): training-mode dropout not implemented (inference semantics).
    h = jnp.dot(w1_ref[...], x, preferred_element_type=jnp.float32)
    h = jnp.maximum(h + b1, 0.0)                              # [H1, TN] f32

    # lins[1]: BatchNorm1d(h1) eval mode folded to per-feature affine -> ReLU
    h = jnp.maximum(h * scale + shift, 0.0)

    # lins[2]: Linear(h1, h2) -> ReLU.  Native bf16 MXU inputs, f32 accumulate.
    h = jnp.dot(w2_ref[...], h.astype(jnp.bfloat16),
                preferred_element_type=jnp.float32)
    h = jnp.maximum(h + b2_ref[...], 0.0)                     # [H2, TN] f32

    # lins[3]: Linear(h2, out) -> Softmax over the class (sublane) axis.
    logits = jnp.dot(w3_ref[...], h.astype(jnp.bfloat16),
                     preferred_element_type=jnp.float32) + b3_ref[...]
    m = jnp.max(logits, axis=0, keepdims=True)
    e = jnp.exp(logits - m)
    denom = jnp.sum(e, axis=0, keepdims=True)
    # Exact f32 divide so each column sums to 1 (approx reciprocal was off >1e-3).
    o_ref[...] = (e / denom).astype(o_ref.dtype)


def link_predictor_forward_fm(x_t, params, *, tn=16384):
    """Feature-major entry point.

    x_t: [in_channels, N], ideally already bf16 (batch on the 128-lane axis).
    params: PyTorch-layout dict (see __main__).
    Returns softmax probabilities, feature-major [out_channels, N], float32.
    """
    in_c, N = x_t.shape
    h1 = params["w1"].shape[1]
    h2 = params["w2"].shape[1]
    out_c = params["w3"].shape[1]

    # Clamp the tile to the (128-rounded) batch so tiny batches don't waste
    # compute on masked columns; keep it a multiple of the 128-lane width.
    tn = max(128, min(tn, pl.cdiv(N, 128) * 128))
    assert tn % 128 == 0
    n_blocks = pl.cdiv(N, tn)          # ragged tail handled by masked writeback

    if x_t.dtype != jnp.bfloat16:      # prefer plumbing bf16 from the producer
        x_t = x_t.astype(jnp.bfloat16)

    col = lambda a: jnp.reshape(a, (-1, 1)).astype(jnp.float32)
    w1_t = params["w1"].T.astype(jnp.bfloat16)                # [h1, in_c]
    w2_t = params["w2"].T.astype(jnp.bfloat16)                # [h2, h1]
    w3_t = params["w3"].T.astype(jnp.bfloat16)                # [out_c, h2]
    # Pack the three per-feature H1 constants into one operand: fewer tiny DMAs.
    aff = jnp.concatenate(
        [col(params["b1"]), col(params["scale"]), col(params["shift"])],
        axis=1)                                               # [h1, 3] f32
    b2_c = col(params["b2"])
    b3_c = col(params["b3"])

    full2d = lambda a: pl.BlockSpec(a.shape, lambda i: (0, 0))

    # Advisory cost estimate (includes per-step weight/constant re-fetch).
    n_pad = n_blocks * tn
    matmul_flops = 2 * n_pad * (in_c * h1 + h1 * h2 + h2 * out_c)
    bytes_accessed = (in_c * N * 2                            # x stream (bf16)
                      + out_c * N * 4                         # probs write (f32)
                      + n_blocks * 2 * (w1_t.size + w2_t.size + w3_t.size)
                      + n_blocks * 4 * (aff.size + b2_c.size + b3_c.size))

    # Rough VMEM need: double-buffered x/out tiles + f32/bf16 intermediates.
    bytes_per_col = (2 * in_c * 2 + 2 * out_c * 4
                     + h1 * 6 + h2 * 6 + out_c * 12)
    vmem_bytes = tn * bytes_per_col + (512 << 10)
    # Raise the scoped-VMEM limit with the tile (v5e default is only ~16 MiB);
    # cap well under 128 MiB physical.  On v7x (64 MiB physical) keep tn<=16384.
    vmem_limit = int(min(100 << 20, max(32 << 20, 1.5 * vmem_bytes)))

    out_t = pl.pallas_call(
        link_predictor_kernel,
        out_shape=jax.ShapeDtypeStruct((out_c, N), jnp.float32),
        grid_spec=pltpu.PrefetchScalarGridSpec(
            num_scalar_prefetch=0,
            grid=(n_blocks,),
            in_specs=[
                pl.BlockSpec((in_c, tn), lambda i: (0, i)),   # lane-dense x tile
                full2d(w1_t), full2d(aff),
                full2d(w2_t), full2d(b2_c),
                full2d(w3_t), full2d(b3_c),
            ],
            out_specs=pl.BlockSpec((out_c, tn), lambda i: (0, i)),
        ),
        compiler_params=pltpu.CompilerParams(
            dimension_semantics=("parallel",),
            vmem_limit_bytes=vmem_limit),
        cost_estimate=pl.CostEstimate(
            flops=matmul_flops,
            transcendentals=n_pad * out_c,
            bytes_accessed=bytes_accessed),
    )(x_t, w1_t, aff, w2_t, b2_c, w3_t, b3_c)

    return out_t                                               # [out_c, N] f32


def link_predictor_forward(x, params, *, tn=16384):
    """Row-major convenience wrapper ([N, in_c] -> [N, out_c]).

    Adds transpose passes on both sides; prefer the feature-major entry point
    (and a bf16 x produced upstream) in production.
    """
    out_t = link_predictor_forward_fm(
        jnp.transpose(x).astype(jnp.bfloat16), params, tn=tn)
    return jnp.transpose(out_t)


def reference_forward(x, params):
    # Mirror the kernel's quantization model: bf16 weights/activations feeding
    # each matmul, f32 accumulation, f32 post-matmul math, exact softmax.
    q = lambda a: a.astype(jnp.bfloat16).astype(jnp.float32)
    h = jnp.maximum(q(x) @ q(params["w1"]) + params["b1"], 0.0)
    h = jnp.maximum(h * params["scale"] + params["shift"], 0.0)
    h = jnp.maximum(q(h) @ q(params["w2"]) + params["b2"], 0.0)
    logits = q(h) @ q(params["w3"]) + params["b3"]
    return jax.nn.softmax(logits, axis=-1)


if __name__ == "__main__":
    # Module-consistent shapes:
    # in_channels=32, hidden_channels=32, out_channels=8, num_layers=3, dropout=0.5
    # N=1000 is deliberately not a multiple of the tile -> masked ragged block.
    N, IN_C, H1, OUT_C = 1000, 32, 32, 8
    H2 = H1 // 2
    EPS = 1e-5
    TN = 512   # 2 grid steps at this small demo size (production default 16384)

    key = jax.random.PRNGKey(0)
    keys = jax.random.split(key, 11)

    x = jax.random.normal(keys[0], (N, IN_C), dtype=jnp.float32)

    # Deterministic synthetic parameter init (not a checkpoint load).
    w1 = jax.random.normal(keys[1], (IN_C, H1), dtype=jnp.float32) * 0.1
    b1 = jax.random.normal(keys[2], (1, H1), dtype=jnp.float32) * 0.1
    w2 = jax.random.normal(keys[3], (H1, H2), dtype=jnp.float32) * 0.1
    b2 = jax.random.normal(keys[4], (1, H2), dtype=jnp.float32) * 0.1
    w3 = jax.random.normal(keys[5], (H2, OUT_C), dtype=jnp.float32) * 0.1
    b3 = jax.random.normal(keys[6], (1, OUT_C), dtype=jnp.float32) * 0.1

    # BatchNorm1d(H1) in eval mode: y = (x - mean)/sqrt(var+eps)*gamma + beta,
    # folded into a per-feature affine (scale, shift).
    gamma = 1.0 + 0.1 * jax.random.normal(keys[7], (1, H1), dtype=jnp.float32)
    beta = 0.1 * jax.random.normal(keys[8], (1, H1), dtype=jnp.float32)
    run_mean = 0.1 * jax.random.normal(keys[9], (1, H1), dtype=jnp.float32)
    run_var = jnp.abs(jax.random.normal(keys[10], (1, H1), dtype=jnp.float32)) + 0.5
    scale = gamma / jnp.sqrt(run_var + EPS)
    shift = beta - run_mean * scale

    params = dict(w1=w1, b1=b1, scale=scale, shift=shift,
                  w2=w2, b2=b2, w3=w3, b3=b3)

    # Producer-side feature-major bf16 x (the layout the kernel wants to see).
    x_t = jnp.transpose(x).astype(jnp.bfloat16)                # [IN_C, N]

    out_t = link_predictor_forward_fm(x_t, params, tn=TN)
    out_t = jax.block_until_ready(out_t)
    assert out_t.shape == (OUT_C, N)

    out = jnp.transpose(out_t)                                 # consumer-side view
    ref = reference_forward(x, params)
    assert out.shape == (N, OUT_C)
    # Reference mirrors the bf16 quantization; residual error is only MXU
    # accumulation order + exp.
    assert jnp.allclose(out, ref, atol=1e-3, rtol=1e-3)
    # Exact f32 divide in the kernel -> rows normalize to 1 within f32 rounding.
    assert jnp.allclose(jnp.sum(out, axis=-1), 1.0, atol=1e-3)

    print("KERNEL_OK")
</pallas_src>

<mosaic_0001>
module attributes {stable_mosaic.version = 11 : i64} {
  func.func @link_predictor_kernel(%arg0: i32, %arg1: memref<32x512xbf16, #tpu.memory_space<vmem>>, %arg2: memref<32x32xbf16, #tpu.memory_space<vmem>>, %arg3: memref<32x3xf32, #tpu.memory_space<vmem>>, %arg4: memref<16x32xbf16, #tpu.memory_space<vmem>>, %arg5: memref<16x1xf32, #tpu.memory_space<vmem>>, %arg6: memref<8x16xbf16, #tpu.memory_space<vmem>>, %arg7: memref<8x1xf32, #tpu.memory_space<vmem>>, %arg8: memref<8x512xf32, #tpu.memory_space<vmem>>) attributes {dimension_semantics = [#tpu.dimension_semantics<parallel>], iteration_bounds = array<i64: 2>, scalar_prefetch = 0 : i64, scratch_operands = 0 : i64, tpu.core_type = #tpu.core_type<tc>, window_params = [{transform_indices = @transform_0, window_bounds = array<i64: 32, 512>}, {pipeline_mode = #tpu.pipeline_mode<synchronous>, transform_indices = @transform_1, window_bounds = array<i64: 32, 32>}, {pipeline_mode = #tpu.pipeline_mode<synchronous>, transform_indices = @transform_2, window_bounds = array<i64: 32, 3>}, {pipeline_mode = #tpu.pipeline_mode<synchronous>, transform_indices = @transform_3, window_bounds = array<i64: 16, 32>}, {pipeline_mode = #tpu.pipeline_mode<synchronous>, transform_indices = @transform_4, window_bounds = array<i64: 16, 1>}, {pipeline_mode = #tpu.pipeline_mode<synchronous>, transform_indices = @transform_5, window_bounds = array<i64: 8, 16>}, {pipeline_mode = #tpu.pipeline_mode<synchronous>, transform_indices = @transform_6, window_bounds = array<i64: 8, 1>}, {transform_indices = @transform_7, window_bounds = array<i64: 8, 512>}]} {
    %c0 = arith.constant 0 : index
    %c0_0 = arith.constant 0 : index
    %0 = vector.load %arg1[%c0, %c0_0] : memref<32x512xbf16, #tpu.memory_space<vmem>>, vector<32x512xbf16>
    %c0_1 = arith.constant 0 : index
    %c0_2 = arith.constant 0 : index
    %1 = vector.load %arg3[%c0_1, %c0_2] : memref<32x3xf32, #tpu.memory_space<vmem>>, vector<32x1xf32>
    %c0_3 = arith.constant 0 : index
    %c1 = arith.constant 1 : index
    %2 = vector.load %arg3[%c0_3, %c1] : memref<32x3xf32, #tpu.memory_space<vmem>>, vector<32x1xf32>
    %c0_4 = arith.constant 0 : index
    %c2 = arith.constant 2 : index
    %3 = vector.load %arg3[%c0_4, %c2] : memref<32x3xf32, #tpu.memory_space<vmem>>, vector<32x1xf32>
    %c0_5 = arith.constant 0 : index
    %c0_6 = arith.constant 0 : index
    %4 = vector.load %arg2[%c0_5, %c0_6] : memref<32x32xbf16, #tpu.memory_space<vmem>>, vector<32x32xbf16>
    %cst = arith.constant dense<0.000000e+00> : vector<32x512xf32>
    %5 = tpu.matmul %4, %0, %cst {dimension_numbers = #tpu.dot_dimension_numbers<[1], [0], [0], [1], [0, 0, 1, 1], [], []>} : vector<32x32xbf16>, vector<32x512xbf16>, vector<32x512xf32> -> vector<32x512xf32>
    %6 = vector.broadcast %1 : vector<32x1xf32> to vector<32x512xf32>
    %7 = arith.addf %5, %6 : vector<32x512xf32>
    %cst_7 = arith.constant 0.000000e+00 : f32
    %8 = vector.broadcast %cst_7 : f32 to vector<32x512xf32>
    %9 = arith.maximumf %7, %8 : vector<32x512xf32>
    %10 = vector.broadcast %2 : vector<32x1xf32> to vector<32x512xf32>
    %11 = arith.mulf %9, %10 : vector<32x512xf32>
    %12 = vector.broadcast %3 : vector<32x1xf32> to vector<32x512xf32>
    %13 = arith.addf %11, %12 : vector<32x512xf32>
    %cst_8 = arith.constant 0.000000e+00 : f32
    %14 = vector.broadcast %cst_8 : f32 to vector<32x512xf32>
    %15 = arith.maximumf %13, %14 : vector<32x512xf32>
    %c0_9 = arith.constant 0 : index
    %c0_10 = arith.constant 0 : index
    %16 = vector.load %arg4[%c0_9, %c0_10] : memref<16x32xbf16, #tpu.memory_space<vmem>>, vector<16x32xbf16>
    %17 = arith.truncf %15 : vector<32x512xf32> to vector<32x512xbf16>
    %cst_11 = arith.constant dense<0.000000e+00> : vector<16x512xf32>
    %18 = tpu.matmul %16, %17, %cst_11 {dimension_numbers = #tpu.dot_dimension_numbers<[1], [0], [0], [1], [0, 0, 1, 1], [], []>} : vector<16x32xbf16>, vector<32x512xbf16>, vector<16x512xf32> -> vector<16x512xf32>
    %c0_12 = arith.constant 0 : index
    %c0_13 = arith.constant 0 : index
    %19 = vector.load %arg5[%c0_12, %c0_13] : memref<16x1xf32, #tpu.memory_space<vmem>>, vector<16x1xf32>
    %20 = vector.broadcast %19 : vector<16x1xf32> to vector<16x512xf32>
    %21 = arith.addf %18, %20 : vector<16x512xf32>
    %cst_14 = arith.constant 0.000000e+00 : f32
    %22 = vector.broadcast %cst_14 : f32 to vector<16x512xf32>
    %23 = arith.maximumf %21, %22 : vector<16x512xf32>
    %c0_15 = arith.constant 0 : index
    %c0_16 = arith.constant 0 : index
    %24 = vector.load %arg6[%c0_15, %c0_16] : memref<8x16xbf16, #tpu.memory_space<vmem>>, vector<8x16xbf16>
    %25 = arith.truncf %23 : vector<16x512xf32> to vector<16x512xbf16>
    %cst_17 = arith.constant dense<0.000000e+00> : vector<8x512xf32>
    %26 = tpu.matmul %24, %25, %cst_17 {dimension_numbers = #tpu.dot_dimension_numbers<[1], [0], [0], [1], [0, 0, 1, 1], [], []>} : vector<8x16xbf16>, vector<16x512xbf16>, vector<8x512xf32> -> vector<8x512xf32>
    %c0_18 = arith.constant 0 : index
    %c0_19 = arith.constant 0 : index
    %27 = vector.load %arg7[%c0_18, %c0_19] : memref<8x1xf32, #tpu.memory_space<vmem>>, vector<8x1xf32>
    %28 = vector.broadcast %27 : vector<8x1xf32> to vector<8x512xf32>
    %29 = arith.addf %26, %28 : vector<8x512xf32>
    %cst_20 = arith.constant dense<0xFF800000> : vector<512xf32>
    %30 = vector.multi_reduction <maximumf>, %29, %cst_20 [0] : vector<8x512xf32> to vector<512xf32>
    %31 = vector.shape_cast %30 : vector<512xf32> to vector<1x512xf32>
    %32 = vector.broadcast %31 : vector<1x512xf32> to vector<8x512xf32>
    %33 = arith.subf %29, %32 : vector<8x512xf32>
    %34 = math.exp %33 : vector<8x512xf32>
    %cst_21 = arith.constant dense<0.000000e+00> : vector<512xf32>
    %35 = vector.multi_reduction <add>, %34, %cst_21 [0] : vector<8x512xf32> to vector<512xf32>
    %36 = vector.shape_cast %35 : vector<512xf32> to vector<1x512xf32>
    %37 = vector.broadcast %36 : vector<1x512xf32> to vector<8x512xf32>
    %38 = arith.divf %34, %37 : vector<8x512xf32>
    %c0_22 = arith.constant 0 : index
    %c0_23 = arith.constant 0 : index
    %39 = vector.load %arg8[%c0_22, %c0_23] : memref<8x512xf32, #tpu.memory_space<vmem>>, vector<8x512xf32>
    tpu.vector_store %arg8[%c0_22, %c0_23], %38 {strides = array<i32>} : memref<8x512xf32, #tpu.memory_space<vmem>>, vector<8x512xf32>,
    return
  }
  func.func @transform_0(%arg0: i32) -> (i32, i32) {
    %c0_i32 = arith.constant 0 : i32
    %c0_i32_0 = arith.constant 0 : i32
    return %c0_i32, %arg0 : i32, i32
  }
  func.func @transform_1(%arg0: i32) -> (i32, i32) {
    %c0_i32 = arith.constant 0 : i32
    %c0_i32_0 = arith.constant 0 : i32
    %c0_i32_1 = arith.constant 0 : i32
    return %c0_i32, %c0_i32_0 : i32, i32
  }
  func.func @transform_2(%arg0: i32) -> (i32, i32) {
    %c0_i32 = arith.constant 0 : i32
    %c0_i32_0 = arith.constant 0 : i32
    %c0_i32_1 = arith.constant 0 : i32
    return %c0_i32, %c0_i32_0 : i32, i32
  }
  func.func @transform_3(%arg0: i32) -> (i32, i32) {
    %c0_i32 = arith.constant 0 : i32
    %c0_i32_0 = arith.constant 0 : i32
    %c0_i32_1 = arith.constant 0 : i32
    return %c0_i32, %c0_i32_0 : i32, i32
  }
  func.func @transform_4(%arg0: i32) -> (i32, i32) {
    %c0_i32 = arith.constant 0 : i32
    %c0_i32_0 = arith.constant 0 : i32
    %c0_i32_1 = arith.constant 0 : i32
    return %c0_i32, %c0_i32_0 : i32, i32
  }
  func.func @transform_5(%arg0: i32) -> (i32, i32) {
    %c0_i32 = arith.constant 0 : i32
    %c0_i32_0 = arith.constant 0 : i32
    %c0_i32_1 = arith.constant 0 : i32
    return %c0_i32, %c0_i32_0 : i32, i32
  }
  func.func @transform_6(%arg0: i32) -> (i32, i32) {
    %c0_i32 = arith.constant 0 : i32
    %c0_i32_0 = arith.constant 0 : i32
    %c0_i32_1 = arith.constant 0 : i32
    return %c0_i32, %c0_i32_0 : i32, i32
  }
  func.func @transform_7(%arg0: i32) -> (i32, i32) {
    %c0_i32 = arith.constant 0 : i32
    %c0_i32_0 = arith.constant 0 : i32
    return %c0_i32, %arg0 : i32, i32
  }
}

</mosaic_0001>

<bundles_post_ra>
// kernel: tpu_custom_call.1
= control target key start
LH: loop header
LB: loop body
LE: loop exit
PB: predicated region body
PF: predicated region fallthrough
CT: control target
= control target key end

     0   :  { %12 = vsyncpa [#allocation3], 0  ;;  %s1515_s0 = inlined_call_operand.hbm [shape: bf16[32,1000], index: 0, kind: input, shape index: {}]   ;;  %s1516_s1 = inlined_call_operand.vmem [shape: bf16[32,32], index: 1, kind: input, shape index: {}]   ;;  %s1517_s2 = inlined_call_operand.vmem [shape: f32[32,3], index: 2, kind: input, shape index: {}]   ;;  %s1518_s3 = inlined_call_operand.vmem [shape: bf16[16,32], index: 3, kind: input, shape index: {}]   ;;  %s1519_s4 = inlined_call_operand.vmem [shape: f32[16,1], index: 4, kind: input, shape index: {}]   ;;  %s1520_s5 = inlined_call_operand.vmem [shape: bf16[8,16], index: 5, kind: input, shape index: {}]   ;;  %s1521_s6 = inlined_call_operand.vmem [shape: f32[8,1], index: 6, kind: input, shape index: {}]   ;;  %s1522_s7 = inlined_call_operand.hbm [shape: f32[8,1000], index: 7, kind: output, shape index: {}]  }
   0x1   :  { %14 = vsyncpa [#allocation3 + $0x1], 0 }
   0x2   :  { %15 = vsyncpa [#allocation4], 0 }
   0x3   :  { %17 = vsyncpa [#allocation4 + $0x1], 0  ;;  %s1248_s24 = smov 0   ;;  %s1250_s25 = smov 0  }
   0x4   :  { %s1252_s26 = smov 0   ;;  %s1254_s27 = smov 0  }
   0x5 LB: > { %s1269_s28 = sadd.s32 4294967295, %s1200_s27   ;;  %s939_s29 = sadd.s32 4294967294, %s1200_s27   ;;  %s1200_s27 = sphi %s1254_s27, %s1533_s27   ;;  %s1196_s26 = sphi %s1252_s26, %s1532_s26   ;;  %s1192_s25 = sphi %s1250_s25, %s1531_s25   ;;  %s1188_s24 = sphi %s1248_s24, %s1530_s24  }
   0x6   : > { %s1273_s30 = sadd.s32 1, %s1200_s27   ;;  %s30_s8 = sadd.s32 1, %s1196_s26 }
   0x7   : > { %s27_s9 = ssub.s32 %s1200_s27, %s1273_s30  ;;  %p37_p0 = scmp.ne.s32.totalorder %s1196_s26, %s1192_s25 }
   0x8   : > { %p28_p1 = scmp.eq.s32.totalorder %s27_s9, 0  ;;  %p38_p2 = scmp.eq.s32.totalorder %s1200_s27, 0 }
   0x9   : > { %p43_p3 = scmp.ne.s32.totalorder %s1192_s25, %s1188_s24  ;;  %p44_p4 = scmp.eq.s32.totalorder %s1269_s28, 0 }
   0xa   : > { %s1285_s10 = scalar_select %p28_p1, %s1196_s26, %s30_s8  }
   0xb   : > { %p1287_p5 = por %p38_p2, %p37_p0  ;;  %p1291_p6 = por %p44_p4, %p43_p3 }
   0xc   : > { %1523 = sst [smem:[#allocation8_spill]] %s1285_s10  ;;  %p193_p7 = scmp.eq.s32.totalorder %s1269_s28, 1 }
   0xd   : > { %p199_p8 = scmp.eq.s32.totalorder %s939_s29, 1  ;;  %p941_p9 = scmp.ge.s32.totalorder %s1200_s27, 2 }
   0xe   : > { %p1038_p10 = scmp.lt.s32.totalorder %s1200_s27, 2  ;;  %p1298_p11 = por %p193_p7, %p37_p0 }
   0xf   : > { %p1302_p12 = por %p199_p8, %p43_p3  ;;  %s237_s15 = sand.u32 1, %s1196_s26  }
  0x10   : > { %s1013_s16 = sshll.u32 %s1200_s27, 4  ;;  %s942_s17 = sshll.u32 %s237_s15, 6 }
  0x11   : > { %s246_s20 = scalar_lea.hbm %s1515_s0, %s1013_s16  ;;  %s241_s22 = scalar_lea.vmem [#allocation2], %s942_s17 }
  0x12   : > { %s247_s21 = sshll.u32 %s246_s20, 4  ;;  %s249_s23 = sshll.u32 %s241_s22, 4  ;;  %s248_s21 = int_to_ptr.hbm [resolvable:$true] %s247_s21  ;;  %s250_s23 = int_to_ptr.vmem [resolvable:$true] %s249_s23 }
  0x13   : > { %p1313_p13 = pnand %p1038_p10, %p1287_p5  ;;  %p945_p0 = scmp.ge.s32.totalorder %s1200_s27, 1 }
  0x14   : > { %s238_s8 = scalar_lea.sflag [#allocation3], %s237_s15  ;;  %s1104_s9 = sshra.s32 %s248_s21, 4  ;;  %s1105_s9 = int_to_ptr.hbm [resolvable:$true] %s1104_s9 }
  0x15   : > { %s1106_s10 = scalar_lea.hbm %s1105_s9, 64  ;;  %p1108_p2 = pneg %p1313_p13 }
  0x16   : > { %p1107_p1 = scmp.ne.s32.totalorder %s1105_s9, %s1106_s10  ;;  %s1111_s18 = scalar_lea.hbm %s1515_s0, 128 }
  0x17   : > { %p1112_p5 = scmp.lt.s32.totalorder %s1105_s9, %s1515_s0  ;;  %p1113_p7 = scmp.lt.s32.totalorder %s1111_s18, %s1106_s10 }
  0x18   : > { %p1109_p3 = pnand %p1108_p2, %p1107_p1 }
  0x19   : > { %p1114_p8 = por %p1113_p7, %p1112_p5 }
  0x1a   : > { %p1110_p4 = pneg %p1109_p3 }
  0x1c   : > { %p1115_p10 = pnand %p1114_p8, %p1110_p4 }
  0x1e   : > { %1118 = shalt.err (!%p1115_p10)
}
  0x1f   : > { %s1202_s15 = smov 512   ;;  %s1203_s20 = smov 256  }
  0x20   : > { %s1204_s22 = smov 16   ;;  %p257_p1 = scmp.lt.s32.totalorder %s1200_s27, 3 }
  0x21   : > { %1033 = dma.hbm_to_vmem [thread:$0]  (!%p1313_p13), %s248_s21, 1024, %s250_s23, %s238_s8, %s1202_s15, %s1203_s20, %s1204_s22  }
  0x22   : > { %p258_p2 = pnand %p945_p0, %p257_p1 }
  0x23   : > { %s1332_s16 = sand.u32 (!%p258_p2), 1, %s1192_s25  }
  0x24   : > { %261 = sbr.rel (%p258_p2) target bundleno = 572 (0x23c), region = 48  ;;  %s946_s10 = sshll.u32 (!%p258_p2), %s1332_s16, 6 }
  0x25   : > { %s264_s9 = scalar_lea.sflag (!%p258_p2), [#allocation3], %s1332_s16  ;;  %s1336_s17 = scalar_lea.vmem (!%p258_p2), [#allocation2], %s946_s10 }
  0x29   : > { %1179 = dma.done.wait (%p1291_p6), %s264_s9, 1024  }
  0x2a   : > { %1181 = vsyncadd (%p1291_p6), %s264_s9, 4294966272  ;;  %v1205_v0 = vmov 0   ;;  %v1206_v1 = vmov 1   ;;  %v974_v2 = vld [vmem:[%s1336_s17 + $0x20] sm:$0xf]  ;;  %v312_v28 = vld [vmem:[%s1517_s2 + $0x10] sm:$0xff] }
  0x2b   : > { %1079 = vset.pattern.permute.xlu1 %v1205_v0  ;;  %1078 = vset.pattern.permute.xlu0 %v1205_v0  ;;  %v1020_v3 = vld [vmem:[%s1336_s17 + $0x2c] sm:$0xf0]  ;;  %v1018_v4 = vld [vmem:[%s1336_s17 + $0x24] sm:$0xf]  ;;  %v976_v6 = vld [vmem:[%s1336_s17 + $0x30] sm:$0xf0] }
  0x2c   : > { %1080 = vset.pattern.permute.xlu2 %v1206_v1  ;;  %v975_v5 = vor.u32 %v1020_v3, %v974_v2  ;;  %v982_v7 = vld [vmem:[%s1336_s17 + $0x28] sm:$0xf]  ;;  %v1021_v8 = vld [vmem:[%s1336_s17 + $0x34] sm:$0xf0]  ;;  %v979_v9 = vor.u32 %v1018_v4, %v976_v6  ;;  %v1019_v11 = vld [vmem:[%s1336_s17 + $0x2c] sm:$0xf]  ;;  %330 = vperm.xlu0 %1078, %v312_v28  }
  0x2d   : > { %v983_v10 = vor.u32 %v1021_v8, %v982_v7  ;;  %v984_v12 = vld [vmem:[%s1336_s17 + $0x38] sm:$0xf0]  ;;  %v958_v13 = vld [vmem:[%s1336_s17] sm:$0xf]  ;;  %v1016_v15 = vld [vmem:[%s1336_s17 + $0xc] sm:$0xf0]  ;;  %496 = vperm.xlu2 %1080, %v312_v28  }
  0x2e   : > { %401 = vmatpush.bf16.msra.mxu0 %v975_v5  ;;  %v987_v14 = vor.u32 %v1019_v11, %v984_v12  ;;  %v1014_v16 = vld [vmem:[%s1336_s17 + $0x4] sm:$0xf]  ;;  %v960_v17 = vld [vmem:[%s1336_s17 + $0x10] sm:$0xf0]  ;;  %420 = vmatpush.bf16.msra.mxu1 %v979_v9  ;;  %v959_v18 = vor.u32 %v1016_v15, %v958_v13  ;;  %v966_v20 = vld [vmem:[%s1336_s17 + $0x8] sm:$0xf] }
  0x2f   : > { %439 = vmatpush.bf16.msra.mxu2 %v983_v10  ;;  %v963_v19 = vor.u32 %v1014_v16, %v960_v17  ;;  %v1017_v21 = vld [vmem:[%s1336_s17 + $0x14] sm:$0xf0]  ;;  %v1015_v22 = vld [vmem:[%s1336_s17 + $0xc] sm:$0xf]  ;;  %v968_v24 = vld [vmem:[%s1336_s17 + $0x18] sm:$0xf0] }
  0x30   : > { %458 = vmatpush.bf16.msra.mxu3 %v987_v14  ;;  %v967_v23 = vor.u32 %v1017_v21, %v966_v20  ;;  %v310_v25 = vld [vmem:[%s1517_s2] sm:$0xff]  ;;  %v971_v26 = vor.u32 %v1015_v22, %v968_v24  ;;  %vm388_vm0 = vcmask 261120   ;;  %v311_v29 = vld [vmem:[%s1517_s2 + $0x8] sm:$0xff]  ;;  %v313_v30 = vld [vmem:[%s1517_s2 + $0x18] sm:$0xff]  ;;  %v1207_v32 = vmov 2   ;;  %s947_s15 = sshll.u32 %s1332_s16, 5 }
  0x31   : > { %v1022_v27 = vld [vmem:[%s1516_s1] sm:$0xff]  ;;  %320 = vperm.xlu1 %1079, %v310_v25   ;;  %v1023_v31 = vld [vmem:[%s1516_s1 + $0x8] sm:$0xff]  ;;  %vm672_vm1 = vcmask 130048   ;;  %s1473_s20 = scalar_lea.vmem [#allocation5], %s947_s15  ;;  %s1025_s22 = sshll.u32 %s1269_s28, 5 }
  0x32   : > { %402 = vmatpush.bf16.msra.mxu0 %v959_v18  ;;  %421 = vmatpush.bf16.msra.mxu1 %v963_v19  ;;  %v577_v61 = vld [vmem:[%s1519_s4] sm:$0xff]  ;;  %v578_v62 = vld [vmem:[%s1519_s4 + $0x8] sm:$0xff]  ;;  %s864_s17 = scalar_lea.hbm %s1522_s7, %s1025_s22  ;;  %s866_s28 = sshll.u32 %s1473_s20, 4  ;;  %s867_s28 = int_to_ptr.vmem [resolvable:$true] %s866_s28 }
  0x33   : > { %440 = vmatpush.bf16.msra.mxu2 %v967_v23  ;;  %s868_s12 = sshll.u32 %s864_s17, 4  ;;  %s853_s21 = scalar_lea.sflag [#allocation4], %s1332_s16  ;;  %s869_s12 = int_to_ptr.hbm [resolvable:$true] %s868_s12 }
  0x34   : > { %459 = vmatpush.bf16.msra.mxu3 %v971_v26  ;;  %335 = vperm.xlu0 %1078, %v313_v30   ;;  %s1148_s23 = sshra.s32 %s869_s12, 4  ;;  %s1154_s11 = scalar_lea.hbm %s1522_s7, 64  ;;  %s1149_s23 = int_to_ptr.hbm [resolvable:$true] %s1148_s23 }
  0x35   : > { %988 = vmatmul.msk.bf16.vlgmr.msra.gmra.mxu0 %vm388_vm0, %v1022_v27  ;;  %990 = vmatmul.msk.bf16.vlgmr.msra.gmra.mxu1 %vm388_vm0, %v1022_v27  ;;  %s1150_s29 = scalar_lea.hbm %s1149_s23, 32  ;;  %p1155_p3 = scmp.lt.s32.totalorder %s1149_s23, %s1522_s7 }
  0x36   : > { %992 = vmatmul.msk.bf16.vlgmr.msra.gmra.mxu2 %vm388_vm0, %v1022_v27  ;;  %500 = vperm.xlu2 %1080, %v313_v30   ;;  %p1151_p6 = scmp.ne.s32.totalorder %s1149_s23, %s1150_s29  ;;  %p1156_p4 = scmp.lt.s32.totalorder %s1154_s11, %s1150_s29 }
  0x37   : > { %994 = vmatmul.msk.bf16.vlgmr.msra.gmra.mxu3 %vm388_vm0, %v1022_v27 }
  0x38   : > { %p1152_p13 = pnand %p1151_p6, %p1298_p11  ;;  %p1157_p5 = por %p1156_p4, %p1155_p3 }
  0x39   : > { %325 = vperm.xlu1 %1079, %v311_v29  }
  0x3a   : > { %p1153_p0 = pneg %p1152_p13 }
  0x3c   : > { %1081 = vset.pattern.permute.xlu0 %v1207_v32  ;;  %p1158_p7 = pnand %p1157_p5, %p1153_p0 }
  0x3d   : > { %528 = vperm.xlu0 %1081, %v312_v28  }
  0x3e   : > { %488 = vperm.xlu2 %1080, %v310_v25  }
  0x41   : > { %1082 = vset.pattern.permute.xlu1 %v1207_v32 }
  0x42   : > { %532 = vperm.xlu1 %1082, %v313_v30  }
  0x45   : > { %989 = vmatmul.msk.bf16.gmra.mxu0 %vm388_vm0, %v1023_v31  ;;  %991 = vmatmul.msk.bf16.gmra.mxu1 %vm388_vm0, %v1023_v31 }
  0x46   : > { %993 = vmatmul.msk.bf16.gmra.mxu2 %vm388_vm0, %v1023_v31  ;;  %524 = vperm.xlu0 %1081, %v311_v29  }
  0x47   : > { %995 = vmatmul.msk.bf16.gmra.mxu3 %vm388_vm0, %v1023_v31  ;;  %1084 = vset.pattern.permute.xlu2 %v1207_v32 }
  0x48   : > { %520 = vperm.xlu2 %1084, %v310_v25  }
  0x4a   : > { %1083 = vset.pattern.permute.xlu1 %v1206_v1 }
  0x4b   : > { %492 = vperm.xlu1 %1083, %v311_v29  }
  0x4e   : > { %1087 = vset.pattern.permute.xlu0 %v1205_v0 }
  0x50   : > { %1086 = vset.pattern.permute.xlu2 %v1205_v0 }
  0x51   : > { %586 = vperm.xlu2 %1086, %v578_v62  }
  0x53   : > { %1085 = vset.pattern.permute.xlu1 %v1205_v0 }
  0x54   : > { %581 = vperm.xlu1 %1085, %v577_v61  }
  0x87   : > { %v1389_v33 = vpop.permute.xlu2 %496 }
  0x90   : > { %v1391_v38 = vpop.permute.xlu2 %500 }
  0x98   : > { %v1395_v46 = vpop.permute.xlu2 %488 }
  0x9e   : > { %v331_v35 = vpop.permute.xlu0 %330 }
  0xa2   : > { %v1409_v1 = vpop.permute.xlu2 %520 }
  0xa3   : > { %v321_v34 = vpop.permute.xlu1 %320 }
  0xa6   : > { %v1393_v40 = vpop.permute.xlu0 %335 }
  0xab   : > { %v326_v39 = vpop.permute.xlu1 %325 }
  0xaf   : > { %v1399_v56 = vpop.permute.xlu0 %528 }
  0xb2   : > { %v404_v36 = vpop.f32.mrf.mxu0  ;;  %v423_v37 = vpop.f32.mrf.mxu1 }
  0xb3   : > { %v405_v45 = vadd.f32 %v404_v36, %v321_v34  ;;  %v424_v47 = vadd.f32 %v423_v37, %v321_v34 }
  0xb4   : > { %v1397_v48 = vpop.permute.xlu1 %532 }
  0xb5   : > { %v471_v50 = vmax.f32 %v405_v45, 0.0  ;;  %v472_v53 = vmax.f32 %v424_v47, 0.0 }
  0xb7   : > { %v503_v59 = vmul.f32 %v1395_v46, %v471_v50  ;;  %v504_v63 = vmul.f32 %v1395_v46, %v472_v53 }
  0xb8   : > { %v525_v26 = vpop.permute.xlu0 %524 }
  0xb9   : > { %v442_v41 = vpop.f32.mrf.mxu2  ;;  %v535_v11 = vadd.f32 %v1409_v1, %v503_v59  ;;  %v536_v16 = vadd.f32 %v1409_v1, %v504_v63 }
  0xba   : > { %v461_v42 = vpop.f32.mrf.mxu3  ;;  %v406_v43 = vpop.f32.mrf.mxu0  ;;  %v443_v3 = vadd.f32 %v442_v41, %v321_v34 }
  0xbb   : > { %v425_v44 = vpop.f32.mrf.mxu1  ;;  %v407_v58 = vadd.f32 %v406_v43, %v326_v39  ;;  %v462_v17 = vadd.f32 %v461_v42, %v321_v34  ;;  %v551_v29 = vmax.f32 %v535_v11, 0.0  ;;  %v552_v34 = vmax.f32 %v536_v16, 0.0 }
  0xbc   : > { %v426_v60 = vadd.f32 %v425_v44, %v326_v39  ;;  %v473_v21 = vmax.f32 %v443_v3, 0.0 }
  0xbd   : > { %v475_v4 = vmax.f32 %v407_v58, 0.0  ;;  %v493_v5 = vpop.permute.xlu1 %492 }
  0xbe   : > { %v476_v7 = vmax.f32 %v426_v60, 0.0 }
  0xbf   : > { %v507_v23 = vmul.f32 %v493_v5, %v475_v4 }
  0xc0   : > { %v508_v25 = vmul.f32 %v493_v5, %v476_v7 }
  0xc1   : > { %v444_v49 = vpop.f32.mrf.mxu2  ;;  %v539_v45 = vadd.f32 %v525_v26, %v507_v23 }
  0xc2   : > { %v463_v51 = vpop.f32.mrf.mxu3  ;;  %v409_v52 = vpop.f32.mrf.mxu0  ;;  %v445_v18 = vadd.f32 %v444_v49, %v326_v39 }
  0xc3   : > { %v410_v54 = vadd.f32 %v409_v52, %v331_v35  ;;  %v428_v55 = vpop.f32.mrf.mxu1  ;;  %v464_v22 = vadd.f32 %v463_v51, %v326_v39  ;;  %v505_v39 = vmul.f32 %v1395_v46, %v473_v21  ;;  %v540_v52 = vadd.f32 %v525_v26, %v508_v25 }
  0xc4   : > { %v429_v57 = vadd.f32 %v428_v55, %v331_v35  ;;  %v477_v36 = vmax.f32 %v445_v18, 0.0 }
  0xc5   : > { %v479_v0 = vmax.f32 %v410_v54, 0.0  ;;  %v478_v42 = vmax.f32 %v464_v22, 0.0 }
  0xc6   : > { %v480_v2 = vmax.f32 %v429_v57, 0.0  ;;  %v509_v58 = vmul.f32 %v493_v5, %v477_v36 }
  0xc7   : > { %v511_v12 = vmul.f32 %v1389_v33, %v479_v0  ;;  %v510_v62 = vmul.f32 %v493_v5, %v478_v42 }
  0xc8   : > { %v512_v19 = vmul.f32 %v1389_v33, %v480_v2  ;;  %v555_v2 = vmax.f32 %v539_v45, 0.0  ;;  %v541_v5 = vadd.f32 %v525_v26, %v509_v58 }
  0xc9   : > { %v447_v6 = vpop.f32.mrf.mxu2  ;;  %v543_v32 = vadd.f32 %v1399_v56, %v511_v12  ;;  %v542_v12 = vadd.f32 %v525_v26, %v510_v62 }
  0xca   : > { %v448_v8 = vadd.f32 %v447_v6, %v331_v35  ;;  %v466_v9 = vpop.f32.mrf.mxu3  ;;  %v411_v10 = vpop.f32.mrf.mxu0  ;;  %v544_v41 = vadd.f32 %v1399_v56, %v512_v19  ;;  %v556_v6 = vmax.f32 %v540_v52, 0.0  ;;  %v557_v19 = vmax.f32 %v541_v5, 0.0 }
  0xcb   : > { %v467_v13 = vadd.f32 %v466_v9, %v331_v35  ;;  %v412_v14 = vadd.f32 %v411_v10, %v1393_v40  ;;  %v430_v15 = vpop.f32.mrf.mxu1  ;;  %v474_v35 = vmax.f32 %v462_v17, 0.0  ;;  %v559_v55 = vmax.f32 %v543_v32, 0.0 }
  0xcc   : > { %v431_v20 = vadd.f32 %v430_v15, %v1393_v40  ;;  %v481_v27 = vmax.f32 %v448_v8, 0.0  ;;  %v560_v60 = vmax.f32 %v544_v41, 0.0  ;;  %v569_v10 = vpack.c.bf16 %v555_v2, %v551_v29  ;;  %v587_v29 = vpop.permute.xlu2 %586 }
  0xcd   : > { %v483_v24 = vmax.f32 %v412_v14, 0.0  ;;  %v482_v30 = vmax.f32 %v467_v13, 0.0  ;;  %v570_v13 = vpack.c.bf16 %v556_v6, %v552_v34 }
  0xce   : > { %v484_v28 = vmax.f32 %v431_v20, 0.0  ;;  %v513_v47 = vmul.f32 %v1389_v33, %v481_v27  ;;  %v582_v27 = vpop.permute.xlu1 %581 }
  0xcf   : > { %v515_v31 = vmul.f32 %v1391_v38, %v483_v24  ;;  %v514_v53 = vmul.f32 %v1389_v33, %v482_v30  ;;  %v506_v33 = vmul.f32 %v1395_v46, %v474_v35  ;;  %v1024_v46 = vld [vmem:[%s1518_s3] sm:$0xff] }
  0xd0   : > { %v516_v37 = vmul.f32 %v1391_v38, %v484_v28  ;;  %v545_v7 = vadd.f32 %v1399_v56, %v513_v47  ;;  %v661_v47 = vld [vmem:[%s1520_s5] sm:$0xf] }
  0xd1   : > { %v449_v43 = vpop.f32.mrf.mxu2  ;;  %v547_v44 = vadd.f32 %v1397_v48, %v515_v31  ;;  %v546_v8 = vadd.f32 %v1399_v56, %v514_v53  ;;  %v538_v17 = vadd.f32 %v1409_v1, %v506_v33 }
  0xd2   : > { %v450_v49 = vadd.f32 %v449_v43, %v1393_v40  ;;  %v468_v50 = vpop.f32.mrf.mxu3  ;;  %v548_v51 = vadd.f32 %v1397_v48, %v516_v37  ;;  %v561_v14 = vmax.f32 %v545_v7, 0.0 }
  0xd3   : > { %v469_v54 = vadd.f32 %v468_v50, %v1393_v40  ;;  %v563_v57 = vmax.f32 %v547_v44, 0.0  ;;  %v562_v16 = vmax.f32 %v546_v8, 0.0  ;;  %v554_v22 = vmax.f32 %v538_v17, 0.0 }
  0xd4   : > { %v485_v59 = vmax.f32 %v450_v49, 0.0  ;;  %v564_v61 = vmax.f32 %v548_v51, 0.0 }
  0xd5   : > { %v486_v63 = vmax.f32 %v469_v54, 0.0  ;;  %v573_v0 = vpack.c.bf16 %v563_v57, %v559_v55 }
  0xd6   : > { %v517_v3 = vmul.f32 %v1391_v38, %v485_v59  ;;  %v574_v4 = vpack.c.bf16 %v564_v61, %v560_v60 }
  0xd7   : > { %v518_v40 = vmul.f32 %v1391_v38, %v486_v63  ;;  %603 = vmatpush.bf16.msrb.mxu0 %v573_v0  ;;  %v537_v38 = vadd.f32 %v1409_v1, %v505_v39  ;;  %v666_v1 = vld [vmem:[%s1521_s6] sm:$0xff] }
  0xd8   : > { %617 = vmatpush.bf16.msrb.mxu1 %v574_v4  ;;  %v549_v9 = vadd.f32 %v1397_v48, %v517_v3  ;;  %669 = vperm.xlu0 %1087, %v666_v1  }
  0xd9   : > { %v550_v11 = vadd.f32 %v1397_v48, %v518_v40  ;;  %v558_v48 = vmax.f32 %v542_v12, 0.0  ;;  %v553_v21 = vmax.f32 %v537_v38, 0.0 }
  0xda   : > { %v565_v15 = vmax.f32 %v549_v9, 0.0 }
  0xdb   : > { %604 = vmatpush.bf16.msrb.mxu0 %v569_v10  ;;  %v566_v56 = vmax.f32 %v550_v11, 0.0  ;;  %v571_v23 = vpack.c.bf16 %v557_v19, %v553_v21  ;;  %v572_v24 = vpack.c.bf16 %v558_v48, %v554_v22 }
  0xdc   : > { %618 = vmatpush.bf16.msrb.mxu1 %v570_v13  ;;  %v575_v18 = vpack.c.bf16 %v565_v15, %v561_v14 }
  0xdd   : > { %v576_v20 = vpack.c.bf16 %v566_v56, %v562_v16 }
  0xde   : > { %631 = vmatpush.bf16.msrb.mxu2 %v575_v18  ;;  %1000 = vmatmul.msk.bf16.vlgmr.msrb.gmra.mxu0 %vm388_vm0, %v1024_v46 }
  0xdf   : > { %645 = vmatpush.bf16.msrb.mxu3 %v576_v20  ;;  %1001 = vmatmul.msk.bf16.vlgmr.msrb.gmra.mxu1 %vm388_vm0, %v1024_v46 }
  0xe2   : > { %632 = vmatpush.bf16.msrb.mxu2 %v571_v23 }
  0xe3   : > { %646 = vmatpush.bf16.msrb.mxu3 %v572_v24 }
  0xe5   : > { %1002 = vmatmul.msk.bf16.vlgmr.msrb.gmra.mxu2 %vm388_vm0, %v1024_v46 }
  0xe6   : > { %1003 = vmatmul.msk.bf16.vlgmr.msrb.gmra.mxu3 %vm388_vm0, %v1024_v46 }
 0x14a   : > { %v670_v62 = vpop.permute.xlu0 %669 }
 0x15b   : > { %v606_v25 = vpop.f32.mrf.mxu0 }
 0x15c   : > { %v620_v26 = vpop.f32.mrf.mxu1  ;;  %v607_v28 = vadd.f32 %v606_v25, %v582_v27 }
 0x15d   : > { %v621_v30 = vadd.f32 %v620_v26, %v582_v27 }
 0x15e   : > { %v653_v32 = vmax.f32 %v607_v28, 0.0 }
 0x15f   : > { %v654_v36 = vmax.f32 %v621_v30, 0.0 }
 0x163   : > { %v608_v31 = vpop.f32.mrf.mxu0 }
 0x164   : > { %v609_v34 = vadd.f32 %v608_v31, %v587_v29  ;;  %v622_v35 = vpop.f32.mrf.mxu1 }
 0x165   : > { %v623_v37 = vadd.f32 %v622_v35, %v587_v29 }
 0x166   : > { %v657_v41 = vmax.f32 %v609_v34, 0.0 }
 0x167   : > { %v658_v39 = vmax.f32 %v623_v37, 0.0 }
 0x168   : > { %v662_v42 = vpack.c.bf16 %v657_v41, %v653_v32  ;;  %v634_v43 = vpop.f32.mrf.mxu2 }
 0x169   : > { %v663_v44 = vpack.c.bf16 %v658_v39, %v654_v36  ;;  %v648_v45 = vpop.f32.mrf.mxu3  ;;  %v635_v49 = vadd.f32 %v634_v43, %v582_v27 }
 0x16a   : > { %683 = vmatpush.bf16.msra.mxu0 %v662_v42  ;;  %v649_v50 = vadd.f32 %v648_v45, %v582_v27 }
 0x16b   : > { %696 = vmatpush.bf16.msra.mxu1 %v663_v44  ;;  %v655_v55 = vmax.f32 %v635_v49, 0.0 }
 0x16c   : > { %v656_v58 = vmax.f32 %v649_v50, 0.0 }
 0x16d   : > { %1004 = vmatmul.msk.bf16.vlgmr.msra.gmra.mxu0 %vm672_vm1, %v661_v47 }
 0x16e   : > { %1005 = vmatmul.msk.bf16.vlgmr.msra.gmra.mxu1 %vm672_vm1, %v661_v47 }
 0x170   : > { %v636_v51 = vpop.f32.mrf.mxu2 }
 0x171   : > { %v637_v52 = vadd.f32 %v636_v51, %v587_v29  ;;  %v650_v53 = vpop.f32.mrf.mxu3 }
 0x172   : > { %v651_v54 = vadd.f32 %v650_v53, %v587_v29 }
 0x173   : > { %v659_v57 = vmax.f32 %v637_v52, 0.0 }
 0x174   : > { %v660_v59 = vmax.f32 %v651_v54, 0.0 }
 0x175   : > { %v664_v60 = vpack.c.bf16 %v659_v57, %v655_v55 }
 0x176   : > { %v665_v61 = vpack.c.bf16 %v660_v59, %v656_v58 }
 0x177   : > { %709 = vmatpush.bf16.msra.mxu2 %v664_v60 }
 0x178   : > { %722 = vmatpush.bf16.msra.mxu3 %v665_v61 }
 0x17a   : > { %1006 = vmatmul.msk.bf16.vlgmr.msra.gmra.mxu2 %vm672_vm1, %v661_v47 }
 0x17b   : > { %1007 = vmatmul.msk.bf16.vlgmr.msra.gmra.mxu3 %vm672_vm1, %v661_v47 }
 0x1ea   : > { %v685_v63 = vpop.f32.mrf.mxu0 }
 0x1eb   : > { %v686_v0 = vadd.f32 %v685_v63, %v670_v62  ;;  %v698_v2 = vpop.f32.mrf.mxu1 }
 0x1ec   : > { %v699_v3 = vadd.f32 %v698_v2, %v670_v62 }
 0x1ed   : > { %v728_v4 = vrot.slane %v686_v0, 4 }
 0x1ee   : > { %v734_v6 = vrot.slane %v699_v3, 4 }
 0x1ef   : > { %v729_v7 = vmax.f32 %v686_v0, %v728_v4 }
 0x1f0   : > { %v735_v33 = vmax.f32 %v699_v3, %v734_v6 }
 0x1f1   : > { %v730_v40 = vrot.slane %v729_v7, 2 }
 0x1f2   : > { %v736_v8 = vrot.slane %v735_v33, 2  ;;  %v687_v9 = vpop.f32.mrf.mxu0 }
 0x1f3   : > { %v731_v5 = vmax.f32 %v729_v7, %v730_v40  ;;  %v700_v10 = vpop.f32.mrf.mxu1 }
 0x1f4   : > { %v737_v11 = vmax.f32 %v735_v33, %v736_v8 }
 0x1f5   : > { %v732_v12 = vrot.slane %v731_v5, 1 }
 0x1f6   : > { %v738_v13 = vrot.slane %v737_v11, 1 }
 0x1f7   : > { %v733_v14 = vmax.f32 %v731_v5, %v732_v12 }
 0x1f8   : > { %v739_v15 = vmax.f32 %v737_v11, %v738_v13 }
 0x1f9   : > { %v752_v46 = vsub.f32 %v686_v0, %v733_v14 }
 0x1fa   : > { %v753_v38 = vsub.f32 %v699_v3, %v739_v15 }
 0x1fb   : > { %v756_v16 = vmul.f32 1.442695, %v752_v46 }
 0x1fc   : > { %v758_v56 = vmul.f32 1.442695, %v753_v38 }
 0x1fd   : > { %1088 = vpow2.f32 %v756_v16  ;;  %v711_v17 = vpop.f32.mrf.mxu2 }
 0x1fe   : > { %1090 = vpow2.f32 %v758_v56  ;;  %v712_v18 = vadd.f32 %v711_v17, %v670_v62  ;;  %v724_v19 = vpop.f32.mrf.mxu3 }
 0x1ff   : > { %v725_v20 = vadd.f32 %v724_v19, %v670_v62 }
 0x200   : > { %v740_v48 = vrot.slane %v712_v18, 4 }
 0x201   : > { %v746_v21 = vrot.slane %v725_v20, 4 }
 0x202   : > { %v741_v22 = vmax.f32 %v712_v18, %v740_v48 }
 0x203   : > { %v1454_v23 = vpop.eup %1088  ;;  %v747_v24 = vmax.f32 %v725_v20, %v746_v21 }
 0x204   : > { %v1456_v1 = vpop.eup %1090  ;;  %v764_v25 = vrot.slane %v1454_v23, 4  ;;  %v742_v26 = vrot.slane %v741_v22, 2 }
 0x205   : > { %v770_v27 = vrot.slane %v1456_v1, 4  ;;  %v748_v28 = vrot.slane %v747_v24, 2  ;;  %v713_v29 = vpop.f32.mrf.mxu2 }
 0x206   : > { %v765_v30 = vadd.f32 %v1454_v23, %v764_v25  ;;  %v743_v31 = vmax.f32 %v741_v22, %v742_v26  ;;  %v726_v32 = vpop.f32.mrf.mxu3 }
 0x207   : > { %v771_v34 = vadd.f32 %v1456_v1, %v770_v27  ;;  %v749_v35 = vmax.f32 %v747_v24, %v748_v28 }
 0x208   : > { %v766_v36 = vrot.slane %v765_v30, 2  ;;  %v744_v37 = vrot.slane %v743_v31, 1 }
 0x209   : > { %v772_v41 = vrot.slane %v771_v34, 2  ;;  %v750_v39 = vrot.slane %v749_v35, 1 }
 0x20a   : > { %v767_v42 = vadd.f32 %v766_v36, %v765_v30  ;;  %v745_v43 = vmax.f32 %v743_v31, %v744_v37 }
 0x20b   : > { %v773_v44 = vadd.f32 %v772_v41, %v771_v34  ;;  %v751_v45 = vmax.f32 %v749_v35, %v750_v39 }
 0x20c   : > { %v768_v47 = vrot.slane %v767_v42, 1  ;;  %v754_v49 = vsub.f32 %v712_v18, %v745_v43 }
 0x20d   : > { %v774_v50 = vrot.slane %v773_v44, 1  ;;  %v755_v51 = vsub.f32 %v725_v20, %v751_v45 }
 0x20e   : > { %v769_v52 = vadd.f32 %v768_v47, %v767_v42  ;;  %v760_v53 = vmul.f32 1.442695, %v754_v49 }
 0x20f   : > { %v775_v54 = vadd.f32 %v774_v50, %v773_v44  ;;  %v762_v55 = vmul.f32 1.442695, %v755_v51 }
 0x210   : > { %1092 = vrcp.f32 %v769_v52  ;;  %v797_v3 = vand.u32 2147483647, %v769_v52  ;;  %v799_v4 = vand.u32 2147483648, %v769_v52  ;;  %vm793_vm4 = vweird.f32 %v769_v52 }
 0x211   : > { %1094 = vrcp.f32 %v775_v54  ;;  %v814_v40 = vand.u32 2147483648, %v775_v54  ;;  %v812_v5 = vand.u32 2147483647, %v775_v54  ;;  %vm808_vm6 = vweird.f32 %v775_v54 }
 0x212   : > { %1096 = vpow2.f32 %v760_v53  ;;  %v800_v13 = vor.u32 1.1754944e-38, %v799_v4  ;;  %vm798_vm7 = vcmp.eq.f32.partialorder %v797_v3, 8.507059e+37 }
 0x213   : > { %1098 = vpow2.f32 %v762_v55  ;;  %v815_v38 = vor.u32 1.1754944e-38, %v814_v40  ;;  %vm813_vm9 = vcmp.eq.f32.partialorder %v812_v5, 8.507059e+37 }
 0x216   : > { %v1093_v57 = vpop.eup %1092 }
 0x217   : > { %v1095_v58 = vpop.eup %1094  ;;  %v789_v59 = vmul.f32 %v1093_v57, %v769_v52  ;;  %vm794_vm2 = vweird.f32 %v1093_v57 }
 0x218   : > { %v1462_v60 = vpop.eup %1096  ;;  %v804_v61 = vmul.f32 %v1095_v58, %v775_v54  ;;  %vm809_vm3 = vweird.f32 %v1095_v58  ;;  %vm795_vm5 = vmor %vm793_vm4, %vm794_vm2 }
 0x219   : > { %v1464_v62 = vpop.eup %1098  ;;  %v776_v63 = vrot.slane %v1462_v60, 4  ;;  %v790_v0 = vsub.f32 1.0, %v789_v59  ;;  %vm810_vm8 = vmor %vm808_vm6, %vm809_vm3 }
 0x21a   : > { %v782_v2 = vrot.slane %v1464_v62, 4  ;;  %v805_v6 = vsub.f32 1.0, %v804_v61 }
 0x21b   : > { %v777_v7 = vadd.f32 %v1462_v60, %v776_v63  ;;  %v791_v33 = vmul.f32 %v1093_v57, %v790_v0 }
 0x21c   : > { %v783_v8 = vadd.f32 %v1464_v62, %v782_v2  ;;  %v806_v9 = vmul.f32 %v1095_v58, %v805_v6 }
 0x21d   : > { %v778_v10 = vrot.slane %v777_v7, 2  ;;  %v792_v11 = vadd.f32 %v1093_v57, %v791_v33 }
 0x21e   : > { %v784_v12 = vrot.slane %v783_v8, 2  ;;  %v807_v14 = vadd.f32 %v1095_v58, %v806_v9 }
 0x21f   : > { %v779_v15 = vadd.f32 %v778_v10, %v777_v7  ;;  %v796_v46 = vsel %vm795_vm5, %v1093_v57, %v792_v11 }
 0x220   : > { %v785_v16 = vadd.f32 %v784_v12, %v783_v8  ;;  %v801_v56 = vsel %vm798_vm7, %v800_v13, %v796_v46  ;;  %v811_v17 = vsel %vm810_vm8, %v1095_v58, %v807_v14 }
 0x221   : > { %v780_v18 = vrot.slane %v779_v15, 1  ;;  %v802_v19 = vmul.f32 %v1454_v23, %v801_v56  ;;  %v816_v20 = vsel %vm813_vm9, %v815_v38, %v811_v17 }
 0x222   : > { %v786_v48 = vrot.slane %v785_v16, 1  ;;  %v817_v21 = vmul.f32 %v1456_v1, %v816_v20 }
 0x223   : > { %v781_v22 = vadd.f32 %v780_v18, %v779_v15  ;;  %848 = vst [vmem:[%s1473_s20] sm:$0xff] %v802_v19 }
 0x224   : > { %v787_v24 = vadd.f32 %v786_v48, %v785_v16  ;;  %849 = vst [vmem:[%s1473_s20 + $0x8] sm:$0xff] %v817_v21 }
 0x225   : > { %1100 = vrcp.f32 %v781_v22  ;;  %v829_v29 = vand.u32 2147483648, %v781_v22  ;;  %v827_v1 = vand.u32 2147483647, %v781_v22  ;;  %vm823_vm12 = vweird.f32 %v781_v22 }
 0x226   : > { %1102 = vrcp.f32 %v787_v24  ;;  %v844_v32 = vand.u32 2147483648, %v787_v24  ;;  %v842_v35 = vand.u32 2147483647, %v787_v24  ;;  %vm838_vm14 = vweird.f32 %v787_v24 }
 0x227   : > { %v830_v37 = vor.u32 1.1754944e-38, %v829_v29  ;;  %vm828_vm15 = vcmp.eq.f32.partialorder %v827_v1, 8.507059e+37 }
 0x228   : > { %v845_v42 = vor.u32 1.1754944e-38, %v844_v32  ;;  %vm843_vm1 = vcmp.eq.f32.partialorder %v842_v35, 8.507059e+37 }
 0x22b   : > { %v1101_v25 = vpop.eup %1100 }
 0x22c   : > { %v1103_v26 = vpop.eup %1102  ;;  %v819_v27 = vmul.f32 %v1101_v25, %v781_v22  ;;  %vm824_vm10 = vweird.f32 %v1101_v25 }
 0x22d   : > { %v834_v28 = vmul.f32 %v1103_v26, %v787_v24  ;;  %vm839_vm11 = vweird.f32 %v1103_v26  ;;  %vm825_vm13 = vmor %vm823_vm12, %vm824_vm10 }
 0x22e   : > { %v820_v23 = vsub.f32 1.0, %v819_v27  ;;  %vm840_vm0 = vmor %vm838_vm14, %vm839_vm11 }
 0x22f   : > { %v835_v30 = vsub.f32 1.0, %v834_v28 }
 0x230   : > { %v821_v31 = vmul.f32 %v1101_v25, %v820_v23 }
 0x231   : > { %v836_v34 = vmul.f32 %v1103_v26, %v835_v30 }
 0x232   : > { %v822_v36 = vadd.f32 %v1101_v25, %v821_v31 }
 0x233   : > { %v837_v41 = vadd.f32 %v1103_v26, %v836_v34 }
 0x234   : > { %v826_v39 = vsel %vm825_vm13, %v1101_v25, %v822_v36 }
 0x235   : > { %v831_v43 = vsel %vm828_vm15, %v830_v37, %v826_v39  ;;  %v841_v44 = vsel %vm840_vm0, %v1103_v26, %v837_v41 }
 0x236   : > { %v832_v45 = vmul.f32 %v1462_v60, %v831_v43  ;;  %v846_v47 = vsel %vm843_vm1, %v845_v42, %v841_v44 }
 0x237   : > { %v847_v49 = vmul.f32 %v1464_v62, %v846_v47 }
 0x238   : > { %850 = vst [vmem:[%s1473_s20 + $0x10] sm:$0xff] %v832_v45 }
 0x239   : > { %851 = vst [vmem:[%s1473_s20 + $0x18] sm:$0xff] %v847_v49 }
 0x23a   : > { %1161 = shalt.err (!%p1158_p7)
}
 0x23b   : > { %1028 = dma.vmem_to_hbm [thread:$0]  (%p1298_p11), %s867_s28, 512, %s869_s12, %s853_s21  }
 0x23c PF: > { %s880_s16 = sand.u32 1, %s1188_s24   ;;  %p1035_p8 = pnand %p941_p9, %p1302_p12 }
 0x23d   : > { %s881_s20 = scalar_lea.sflag [#allocation4], %s880_s16 }
 0x23e   : > { %p1036_p10 = pneg %p1035_p8 }
 0x240   : > { %1183 = dma.done.wait (%p1036_p10), %s881_s20, 512  }
 0x241   : > { %1185 = vsyncadd (%p1036_p10), %s881_s20, 4294966784  ;;  %s1529_s22 = sld [smem:[#allocation8_spill]]  ;;  %p20_p1 = scmp.ge.s32.totalorder %s1273_s30, 4  }
 0x242   : > { %s1530_s24 = smov %s1192_s25  ;;  %s1531_s25 = smov %s1196_s26 }
 0x243   : > { %s1533_s27 = smov %s1273_s30  ;;  %22 = sbr.rel (!%p20_p1) target bundleno = 5 (0x5), region = 93 }
 0x247   : > { %s1532_s26 = smov %s1529_s22 }
 0x248   :  { %887 = vsyncpa [#allocation3], 1 }
 0x249   :  { %889 = vsyncpa [#allocation3 + $0x1], 1 }
 0x24a   :  { %890 = vsyncpa [#allocation4], 1 }
 0x24b   :  { %892 = vsyncpa [#allocation4 + $0x1], 1 }

</bundles_post_ra>
